<compile_context>
chip_gen: v7x
topology: tpu7x:2x2x1
jax: 0.10.0
libtpu: 0.0.40
codegen_flags: <defaults>
</compile_context>

<pallas_src>
import functools

import jax
import jax.numpy as jnp
from jax.experimental import pallas as pl
from jax.experimental.pallas import tpu as pltpu

_LANE = 128


def _round_up(n, m):
    return ((n + m - 1) // m) * m


# ---------------------------------------------------------------------------
# Kernels
# ---------------------------------------------------------------------------

def _velocity_kernel(t_ref, x_ref, w1x_ref, w1t_ref, cbias_ref, w2_ref, b2_ref,
                     out_ref):
    """One evaluation of the conditional MLP velocity field.

    h = x @ W1x + t * w1_t + (c @ W1c + b1)      (conditioning bias precomputed)
    v = silu(h) @ W2 + b2
    """
    t = t_ref[0]                                  # scalar ODE time from SMEM
    x = x_ref[...]
    h = jnp.dot(x, w1x_ref[...], preferred_element_type=jnp.float32)
    h = h + t * w1t_ref[...] + cbias_ref[...]
    h = h * jax.nn.sigmoid(h)                     # SiLU (EUP sigmoid + VPU mul)
    v = jnp.dot(h.astype(w2_ref.dtype), w2_ref[...],
                preferred_element_type=jnp.float32) + b2_ref[...]
    out_ref[...] = v.astype(out_ref.dtype)


def _fused_euler_kernel(ts_ref, x_ref, w1x_ref, w1t_ref, cbias_ref, w2_ref,
                        b2_ref, out_ref, *, n_steps):
    """n_steps explicit-Euler updates, weights resident in VMEM across steps."""
    t0 = ts_ref[0]
    dt = ts_ref[1]
    w1x = w1x_ref[...]
    w1t = w1t_ref[...]
    cb = cbias_ref[...]
    w2 = w2_ref[...]
    b2 = b2_ref[...]

    def step(i, xc):
        t = t0 + i * dt                           # int32 * f32 -> f32
        h = jnp.dot(xc, w1x, preferred_element_type=jnp.float32)
        h = h + t * w1t + cb
        h = h * jax.nn.sigmoid(h)
        v = jnp.dot(h.astype(w2.dtype), w2,
                    preferred_element_type=jnp.float32) + b2
        return xc + dt * v

    x0 = x_ref[...].astype(jnp.float32)
    xf = jax.lax.fori_loop(0, n_steps, step, x0, unroll=True)
    out_ref[...] = xf.astype(out_ref.dtype)


# ---------------------------------------------------------------------------
# pallas_call wrappers
# ---------------------------------------------------------------------------

def _common_specs(bm, Dx, Hp):
    in_specs = [
        pl.BlockSpec(memory_space=pltpu.MemorySpace.SMEM),  # scalar(s) t
        pl.BlockSpec((bm, Dx), lambda i: (i, 0)),           # x
        pl.BlockSpec((Dx, Hp), lambda i: (0, 0)),           # W1x
        pl.BlockSpec((1, Hp), lambda i: (0, 0)),            # w1_t row
        pl.BlockSpec((bm, Hp), lambda i: (i, 0)),           # c @ W1c + b1
        pl.BlockSpec((Hp, Dx), lambda i: (0, 0)),           # W2
        pl.BlockSpec((1, Dx), lambda i: (0, 0)),            # b2
    ]
    out_spec = pl.BlockSpec((bm, Dx), lambda i: (i, 0))
    return in_specs, out_spec


def velocity_field_pallas(t, x, w1x, w1t, cbias, w2, b2):
    B, Dx = x.shape
    Hp = w1x.shape[1]
    bm = B if B <= 256 else 256                   # keep VMEM modest on v7x
    in_specs, out_spec = _common_specs(bm, Dx, Hp)
    return pl.pallas_call(
        _velocity_kernel,
        out_shape=jax.ShapeDtypeStruct((B, Dx), x.dtype),
        grid=(pl.cdiv(B, bm),),
        in_specs=in_specs,
        out_specs=out_spec,
        compiler_params=pltpu.CompilerParams(
            dimension_semantics=("parallel",)),
    )(t, x, w1x, w1t, cbias, w2, b2)


def euler_integrate_pallas(t0, t1, n_steps, x0, w1x, w1t, cbias, w2, b2):
    B, Dx = x0.shape
    Hp = w1x.shape[1]
    bm = B if B <= 256 else 256
    dt = (jnp.asarray(t1, jnp.float32) - jnp.asarray(t0, jnp.float32)) / n_steps
    ts = jnp.stack([jnp.asarray(t0, jnp.float32), dt])    # [t0, dt] in SMEM
    in_specs, out_spec = _common_specs(bm, Dx, Hp)
    kernel = functools.partial(_fused_euler_kernel, n_steps=n_steps)
    return pl.pallas_call(
        kernel,
        out_shape=jax.ShapeDtypeStruct((B, Dx), x0.dtype),
        grid=(pl.cdiv(B, bm),),
        in_specs=in_specs,
        out_specs=out_spec,
        compiler_params=pltpu.CompilerParams(
            dimension_semantics=("parallel",)),
    )(ts, x0, w1x, w1t, cbias, w2, b2)


# ---------------------------------------------------------------------------
# torch_wrapper equivalent
# ---------------------------------------------------------------------------

class TorchWrapperPallas:
    """JAX/Pallas equivalent of torch_wrapper: wraps model weights + conditioning c."""

    def __init__(self, params, c):
        w1, b1, w2, b2 = params
        dx = w2.shape[1]
        dc = c.shape[1]
        hidden = w1.shape[1]
        assert w1.shape[0] == dx + dc + 1

        hp = _round_up(hidden, _LANE)
        pad = hp - hidden

        w1x = w1[:dx, :]                 # acts on x
        w1c = w1[dx:dx + dc, :]          # acts on conditioning c
        w1t = w1[dx + dc:, :]            # acts on the broadcast time column

        # c and the weights are fixed across ODE evaluations: fold the
        # conditioning contribution + first-layer bias into a per-row bias
        # ONCE, and lane-pad the hidden dim ONCE (zero per-call cost).
        cond_bias = c @ w1c + b1                                  # [B, H]
        self.w1x = jnp.pad(w1x, ((0, 0), (0, pad)))               # [Dx, Hp]
        self.w1t = jnp.pad(w1t, ((0, 0), (0, pad)))               # [1,  Hp]
        self.cond_bias = jnp.pad(cond_bias, ((0, 0), (0, pad)))   # [B,  Hp]
        self.w2 = jnp.pad(w2, ((0, pad), (0, 0)))                 # [Hp, Dx]
        self.b2 = b2                                              # [1,  Dx]
        self.c = c
        # TODO(synk): for a scaled-up model on v6e/v7x, store w1x/w2 in bf16
        # (keep f32 MXU accumulation via preferred_element_type).

    def __call__(self, t, x):
        # t_ = t.repeat(x.shape[0]) is folded into the kernel: t enters as an
        # SMEM scalar and the broadcast is a single multiply-add on w1_t.
        t_arr = jnp.reshape(jnp.asarray(t, jnp.float32), (1,))
        return velocity_field_pallas(t_arr, x, self.w1x, self.w1t,
                                     self.cond_bias, self.w2, self.b2)

    def integrate_euler(self, x0, t0, t1, n_steps):
        """n_steps Euler evaluations fused into a single pallas_call."""
        return euler_integrate_pallas(t0, t1, n_steps, x0, self.w1x, self.w1t,
                                      self.cond_bias, self.w2, self.b2)


def make_params(key, dx, dc, hidden, dtype=jnp.float32):
    k1, k2 = jax.random.split(key)
    din = dx + dc + 1
    w1 = jax.random.normal(k1, (din, hidden), dtype) * (1.0 / jnp.sqrt(din))
    b1 = jnp.zeros((1, hidden), dtype)
    w2 = jax.random.normal(k2, (hidden, dx), dtype) * (1.0 / jnp.sqrt(hidden))
    b2 = jnp.zeros((1, dx), dtype)
    return (w1, b1, w2, b2)


if __name__ == "__main__":
    key = jax.random.PRNGKey(0)
    kx, kc, kp = jax.random.split(key, 3)

    B, Dx, Dc, H = 8, 16, 8, 32
    x = jax.random.normal(kx, (B, Dx), jnp.float32)
    c = jax.random.normal(kc, (B, Dc), jnp.float32)
    t = jnp.float32(0.5)               # scalar ODE time, as passed by torchdyn

    params = make_params(kp, Dx, Dc, H)
    wrapper = TorchWrapperPallas(params, c)

    out = wrapper(t, x)
    out = jax.block_until_ready(out)

    # Reference check: original concat formulation in plain JAX.
    w1, b1, w2, b2 = params

    def ref_velocity(tt, xx):
        xin = jnp.concatenate([xx, c, jnp.full((B, 1), tt, jnp.float32)], -1)
        h = xin @ w1 + b1
        h = h * jax.nn.sigmoid(h)
        return h @ w2 + b2

    ref = ref_velocity(t, x)
    assert out.shape == x.shape
    assert jnp.allclose(out, ref, atol=2e-5, rtol=2e-5), \
        float(jnp.max(jnp.abs(out - ref)))

    # Fused Euler integration: many model evaluations, one pallas_call.
    n_steps = 4
    fused = jax.block_until_ready(wrapper.integrate_euler(x, 0.0, 1.0, n_steps))

    dt = 1.0 / n_steps
    x_ref = x
    for i in range(n_steps):
        x_ref = x_ref + dt * ref_velocity(jnp.float32(i * dt), x_ref)
    assert jnp.allclose(fused, x_ref, atol=2e-4, rtol=2e-4), \
        float(jnp.max(jnp.abs(fused - x_ref)))

    print("KERNEL_OK")
</pallas_src>

<mosaic_0001>
module attributes {stable_mosaic.version = 11 : i64} {
  func.func @_velocity_kernel(%arg0: i32, %arg1: memref<1xf32, #tpu.memory_space<smem>>, %arg2: memref<8x16xf32, #tpu.memory_space<vmem>>, %arg3: memref<16x128xf32, #tpu.memory_space<vmem>>, %arg4: memref<1x128xf32, #tpu.memory_space<vmem>>, %arg5: memref<8x128xf32, #tpu.memory_space<vmem>>, %arg6: memref<128x16xf32, #tpu.memory_space<vmem>>, %arg7: memref<1x16xf32, #tpu.memory_space<vmem>>, %arg8: memref<8x16xf32, #tpu.memory_space<vmem>>) attributes {dimension_semantics = [#tpu.dimension_semantics<parallel>], iteration_bounds = array<i64: 1>, scalar_prefetch = 0 : i64, scratch_operands = 0 : i64, tpu.core_type = #tpu.core_type<tc>, window_params = [{transform_indices = @transform_0, window_bounds = array<i64: 1>}, {transform_indices = @transform_1, window_bounds = array<i64: 8, 16>}, {pipeline_mode = #tpu.pipeline_mode<synchronous>, transform_indices = @transform_2, window_bounds = array<i64: 16, 128>}, {pipeline_mode = #tpu.pipeline_mode<synchronous>, transform_indices = @transform_3, window_bounds = array<i64: 1, 128>}, {transform_indices = @transform_4, window_bounds = array<i64: 8, 128>}, {pipeline_mode = #tpu.pipeline_mode<synchronous>, transform_indices = @transform_5, window_bounds = array<i64: 128, 16>}, {pipeline_mode = #tpu.pipeline_mode<synchronous>, transform_indices = @transform_6, window_bounds = array<i64: 1, 16>}, {transform_indices = @transform_7, window_bounds = array<i64: 8, 16>}]} {
    %c0 = arith.constant 0 : index
    %0 = memref.load %arg1[%c0] : memref<1xf32, #tpu.memory_space<smem>>
    %c0_0 = arith.constant 0 : index
    %c0_1 = arith.constant 0 : index
    %1 = vector.load %arg2[%c0_0, %c0_1] : memref<8x16xf32, #tpu.memory_space<vmem>>, vector<8x16xf32>
    %c0_2 = arith.constant 0 : index
    %c0_3 = arith.constant 0 : index
    %2 = vector.load %arg3[%c0_2, %c0_3] : memref<16x128xf32, #tpu.memory_space<vmem>>, vector<16x128xf32>
    %cst = arith.constant dense<0.000000e+00> : vector<8x128xf32>
    %3 = tpu.matmul %1, %2, %cst {dimension_numbers = #tpu.dot_dimension_numbers<[1], [0], [0], [1], [0, 0, 1, 1], [], []>} : vector<8x16xf32>, vector<16x128xf32>, vector<8x128xf32> -> vector<8x128xf32>
    %c0_4 = arith.constant 0 : index
    %c0_5 = arith.constant 0 : index
    %4 = vector.load %arg4[%c0_4, %c0_5] : memref<1x128xf32, #tpu.memory_space<vmem>>, vector<1x128xf32>
    %5 = vector.broadcast %0 : f32 to vector<1x128xf32>
    %6 = arith.mulf %5, %4 : vector<1x128xf32>
    %7 = vector.broadcast %6 : vector<1x128xf32> to vector<8x128xf32>
    %8 = arith.addf %3, %7 : vector<8x128xf32>
    %c0_6 = arith.constant 0 : index
    %c0_7 = arith.constant 0 : index
    %9 = vector.load %arg5[%c0_6, %c0_7] : memref<8x128xf32, #tpu.memory_space<vmem>>, vector<8x128xf32>
    %10 = arith.addf %8, %9 : vector<8x128xf32>
    %11 = arith.negf %10 : vector<8x128xf32>
    %12 = math.exp %11 : vector<8x128xf32>
    %cst_8 = arith.constant 1.000000e+00 : f32
    %13 = vector.broadcast %cst_8 : f32 to vector<8x128xf32>
    %14 = arith.addf %13, %12 : vector<8x128xf32>
    %15 = arith.divf %13, %14 : vector<8x128xf32>
    %16 = arith.mulf %10, %15 : vector<8x128xf32>
    %c0_9 = arith.constant 0 : index
    %c0_10 = arith.constant 0 : index
    %17 = vector.load %arg6[%c0_9, %c0_10] : memref<128x16xf32, #tpu.memory_space<vmem>>, vector<128x16xf32>
    %cst_11 = arith.constant dense<0.000000e+00> : vector<8x16xf32>
    %18 = tpu.matmul %16, %17, %cst_11 {dimension_numbers = #tpu.dot_dimension_numbers<[1], [0], [0], [1], [0, 0, 1, 1], [], []>} : vector<8x128xf32>, vector<128x16xf32>, vector<8x16xf32> -> vector<8x16xf32>
    %c0_12 = arith.constant 0 : index
    %c0_13 = arith.constant 0 : index
    %19 = vector.load %arg7[%c0_12, %c0_13] : memref<1x16xf32, #tpu.memory_space<vmem>>, vector<1x16xf32>
    %20 = vector.broadcast %19 : vector<1x16xf32> to vector<8x16xf32>
    %21 = arith.addf %18, %20 : vector<8x16xf32>
    %c0_14 = arith.constant 0 : index
    %c0_15 = arith.constant 0 : index
    %22 = vector.load %arg8[%c0_14, %c0_15] : memref<8x16xf32, #tpu.memory_space<vmem>>, vector<8x16xf32>
    tpu.vector_store %arg8[%c0_14, %c0_15], %21 {strides = array<i32>} : memref<8x16xf32, #tpu.memory_space<vmem>>, vector<8x16xf32>,
    return
  }
  func.func @transform_0(%arg0: i32) -> i32 {
    %c0_i32 = arith.constant 0 : i32
    %c0_i32_0 = arith.constant 0 : i32
    return %c0_i32 : i32
  }
  func.func @transform_1(%arg0: i32) -> (i32, i32) {
    %c0_i32 = arith.constant 0 : i32
    %c0_i32_0 = arith.constant 0 : i32
    return %arg0, %c0_i32 : i32, i32
  }
  func.func @transform_2(%arg0: i32) -> (i32, i32) {
    %c0_i32 = arith.constant 0 : i32
    %c0_i32_0 = arith.constant 0 : i32
    %c0_i32_1 = arith.constant 0 : i32
    return %c0_i32, %c0_i32_0 : i32, i32
  }
  func.func @transform_3(%arg0: i32) -> (i32, i32) {
    %c0_i32 = arith.constant 0 : i32
    %c0_i32_0 = arith.constant 0 : i32
    %c0_i32_1 = arith.constant 0 : i32
    return %c0_i32, %c0_i32_0 : i32, i32
  }
  func.func @transform_4(%arg0: i32) -> (i32, i32) {
    %c0_i32 = arith.constant 0 : i32
    %c0_i32_0 = arith.constant 0 : i32
    return %arg0, %c0_i32 : i32, i32
  }
  func.func @transform_5(%arg0: i32) -> (i32, i32) {
    %c0_i32 = arith.constant 0 : i32
    %c0_i32_0 = arith.constant 0 : i32
    %c0_i32_1 = arith.constant 0 : i32
    return %c0_i32, %c0_i32_0 : i32, i32
  }
  func.func @transform_6(%arg0: i32) -> (i32, i32) {
    %c0_i32 = arith.constant 0 : i32
    %c0_i32_0 = arith.constant 0 : i32
    %c0_i32_1 = arith.constant 0 : i32
    return %c0_i32, %c0_i32_0 : i32, i32
  }
  func.func @transform_7(%arg0: i32) -> (i32, i32) {
    %c0_i32 = arith.constant 0 : i32
    %c0_i32_0 = arith.constant 0 : i32
    return %arg0, %c0_i32 : i32, i32
  }
}

</mosaic_0001>

<bundles_post_ra>
// kernel: tpu_custom_call.1
= control target key start
LH: loop header
LB: loop body
LE: loop exit
PB: predicated region body
PF: predicated region fallthrough
CT: control target
= control target key end

     0   :  { %v356_v2 = vmov 0.0|0.0   ;;  %vm357_vm0 = vmmov 0   ;;  %v358_v4 = vmov 0.0   ;;  %s483_s0 = inlined_call_operand.<no memory space> [shape: f32[1], index: 0, kind: input, shape index: {}]   ;;  %s484_s1 = inlined_call_operand.vmem [shape: f32[8,16], index: 1, kind: input, shape index: {}]   ;;  %s485_s2 = inlined_call_operand.vmem [shape: f32[16,128], index: 2, kind: input, shape index: {}]   ;;  %s486_s3 = inlined_call_operand.vmem [shape: f32[1,128], index: 3, kind: input, shape index: {}]   ;;  %s487_s4 = inlined_call_operand.vmem [shape: f32[8,128], index: 4, kind: input, shape index: {}]   ;;  %s488_s5 = inlined_call_operand.vmem [shape: f32[128,16], index: 5, kind: input, shape index: {}]   ;;  %s489_s6 = inlined_call_operand.vmem [shape: f32[1,16], index: 6, kind: input, shape index: {}]   ;;  %s490_s7 = inlined_call_operand.hbm [shape: f32[8,16], index: 7, kind: output, shape index: {}]  }
   0x1   :  { %v30_v0 = vld [vmem:[%s485_s2] sm:$0xff]  ;;  %v31_v1 = vld [vmem:[%s485_s2 + $0x8] sm:$0xff]  ;;  %297 = vmatprep.subr.bf16.mxu0 %v356_v2  ;;  %259 = vmatprep.mubr.msk.f32.mxu0 %vm357_vm0, %v358_v4 }
   0x2   :  { %v298_v3 = vpack.c.bf16 %v31_v1, %v30_v0 }
   0x3   :  { %13 = vsyncpa [#allocation4], 0  ;;  %300 = vmatprep.subr.bf16.mxu1 %v356_v2  ;;  %294 = vmatprep.mubr.msk.f32.mxu1 %vm357_vm0, %v358_v4  ;;  %v29_v5 = vld [vmem:[%s484_s1] sm:$0xff]  ;;  %vm41_vm1 = vcmask 130048   ;;  %v125_v7 = vld [vmem:[%s488_s5 + $0x8] sm:$0xff]  ;;  %v36_v30 = vlaneseq  ;;  %v33_v33 = vstv %s483_s0  ;;  %s359_s17 = smov [#allocation3]  }
   0x4   :  { %299 = vmatpush3.bf16.msra.mxu0 %v298_v3  ;;  %v124_v6 = vld [vmem:[%s488_s5] sm:$0xff]  ;;  %v126_v9 = vld [vmem:[%s488_s5 + $0x10] sm:$0xff]  ;;  %v127_v10 = vld [vmem:[%s488_s5 + $0x18] sm:$0xff]  ;;  %s224_s18 = sshll.u32 %s359_s17, 4  ;;  %s225_s18 = int_to_ptr.vmem [resolvable:$true] %s224_s18 }
   0x5   :  { %v301_v8 = vpack.c.bf16 %v125_v7, %v124_v6  ;;  %v304_v11 = vpack.c.bf16 %v127_v10, %v126_v9  ;;  %v128_v12 = vld [vmem:[%s488_s5 + $0x20] sm:$0xff]  ;;  %v129_v13 = vld [vmem:[%s488_s5 + $0x28] sm:$0xff]  ;;  %v130_v15 = vld [vmem:[%s488_s5 + $0x30] sm:$0xff]  ;;  %v37_v31 = vshrl.u32 %v36_v30, 7  ;;  %p337_p1 = scmp.lt.s32.totalorder %s225_s18, %s225_s18 }
   0x6   :  { %v307_v14 = vpack.c.bf16 %v129_v13, %v128_v12  ;;  %v131_v16 = vld [vmem:[%s488_s5 + $0x38] sm:$0xff]  ;;  %v132_v18 = vld [vmem:[%s488_s5 + $0x40] sm:$0xff]  ;;  %v133_v19 = vld [vmem:[%s488_s5 + $0x48] sm:$0xff] }
   0x7   :  { %260 = vmatmul.mubr.msk.f32.vlgmr.msra.gmra.mrb[0].mxu0 %vm41_vm1, %v29_v5  ;;  %302 = vmatpush3.bf16.msra.mxu1 %v301_v8  ;;  %v310_v17 = vpack.c.bf16 %v131_v16, %v130_v15  ;;  %v313_v20 = vpack.c.bf16 %v133_v19, %v132_v18  ;;  %v134_v21 = vld [vmem:[%s488_s5 + $0x50] sm:$0xff]  ;;  %v135_v22 = vld [vmem:[%s488_s5 + $0x58] sm:$0xff]  ;;  %v136_v24 = vld [vmem:[%s488_s5 + $0x60] sm:$0xff]  ;;  %v38_v35 = vsub.s32 0, %v37_v31 }
   0x8   :  { %303 = vmatprep.subr.bf16.mxu1 %v356_v2  ;;  %v316_v23 = vpack.c.bf16 %v135_v22, %v134_v21  ;;  %v137_v25 = vld [vmem:[%s488_s5 + $0x68] sm:$0xff]  ;;  %v138_v27 = vld [vmem:[%s488_s5 + $0x70] sm:$0xff]  ;;  %v139_v28 = vld [vmem:[%s488_s5 + $0x78] sm:$0xff] }
   0x9   :  { %v319_v26 = vpack.c.bf16 %v137_v25, %v136_v24  ;;  %v322_v29 = vpack.c.bf16 %v139_v28, %v138_v27  ;;  %v32_v32 = vld [vmem:[%s486_s3] sm:$0x1] }
   0xa   :  { %v34_v34 = vmul.f32 %v33_v33, %v32_v32  ;;  %v115_v38 = vld [vmem:[%s487_s4] sm:$0xff]  ;;  %s332_s4 = scalar_lea.vmem %s225_s18, 128 }
   0xb   :  { %305 = vmatpush3.bf16.msra.mxu1 %v304_v11  ;;  %v234_v47 = vld [vmem:[%s489_s6] ss:$0 sm:$0xff]  ;;  %p333_p0 = scmp.ne.s32.totalorder %s225_s18, %s332_s4  ;;  %p338_p2 = scmp.lt.s32.totalorder %s332_s4, %s332_s4 }
   0xc   :  { %306 = vmatprep.subr.bf16.mxu1 %v356_v2  ;;  %v39_v36 = vrot.slane %v34_v34, %v38_v35 }
   0xd   :  { %p339_p3 = por %p338_p2, %p337_p1 }
   0xf   :  { %308 = vmatpush3.bf16.msra.mxu1 %v307_v14  ;;  %p340_p4 = pnand %p339_p3, %p333_p0 }
  0x10   :  { %309 = vmatprep.subr.bf16.mxu1 %v356_v2 }
  0x13   :  { %311 = vmatpush3.bf16.msra.mxu1 %v310_v17 }
  0x14   :  { %312 = vmatprep.subr.bf16.mxu1 %v356_v2 }
  0x17   :  { %314 = vmatpush3.bf16.msra.mxu1 %v313_v20 }
  0x18   :  { %315 = vmatprep.subr.bf16.mxu1 %v356_v2 }
  0x1b   :  { %317 = vmatpush3.bf16.msra.mxu1 %v316_v23 }
  0x1c   :  { %318 = vmatprep.subr.bf16.mxu1 %v356_v2 }
  0x1f   :  { %320 = vmatpush3.bf16.msra.mxu1 %v319_v26 }
  0x20   :  { %321 = vmatprep.subr.bf16.mxu1 %v356_v2 }
  0x23   :  { %323 = vmatpush3.bf16.msra.mxu1 %v322_v29 }
  0xda   :  { %v111_v37 = vpop.f32.mrb[0].mxu0 }
  0xdb   :  { %v112_v39 = vadd.f32 %v111_v37, %v39_v36  ;;  %v261_v40 = vpop.f32.mrb[1].mxu0 }
  0xdd   :  { %v116_v41 = vadd.f32 %v115_v38, %v112_v39 }
  0xdf   :  { %v233_v42 = vmul.f32 -1.442695, %v116_v41 }
  0xe1   :  { %328 = vpow2.f32 %v233_v42 }
  0xeb   :  { %v329_v43 = vpop.eup %328 }
  0xec   :  { %v120_v44 = vadd.f32 1.0, %v329_v43 }
  0xee   :  { %330 = vrcp.f32 %v120_v44 }
  0xf8   :  { %v331_v45 = vpop.eup %330 }
  0xf9   :  { %v123_v46 = vmul.f32 %v331_v45, %v116_v41 }
  0xfb   :  { %295 = vmatmul.mubr.f32.vlgmr.msra.gmra.mrb[0].mxu1 %v123_v46 }
 0x1ce   :  { %v213_v48 = vpop.f32.mrb[0].mxu1 }
 0x1cf   :  { %v214_v49 = vadd.f32 %v234_v47, %v213_v48  ;;  %v296_v50 = vpop.f32.mrb[1].mxu1 }
 0x1d1   :  { %217 = vst.msk [vmem:[#allocation3] sm:$0xff] %vm41_vm1, %v214_v49 }
 0x1d2   :  { %343 = shalt.err (!%p340_p4)
}
 0x1d3   :  { %s344_s21 = scalar_lea.hbm %s490_s7, 128 }
 0x1d4   :  { %p345_p5 = scmp.ne.s32.totalorder %s490_s7, %s344_s21  ;;  %p348_p6 = scmp.lt.u32.totalorder %s344_s21, %s490_s7 }
 0x1d6   :  { %p350_p7 = pnand %p348_p6, %p345_p5 }
 0x1d8   :  { %353 = shalt.err (!%p350_p7)
}
 0x1d9   :  { %227 = dma.vmem_to_hbm [thread:$0]  %s225_s18, 128, %s490_s7, [#allocation4]  }
 0x1da   :  { %354 = dma.done.wait [#allocation4], 128  }
 0x1db   :  { %355 = vsyncadd [#allocation4], 4294967168 }
 0x1dc   :  { %231 = vsyncpa [#allocation4], 1 }

</bundles_post_ra>
